<compile_context>
chip_gen: v6e
topology: v6e:2x2x1
jax: 0.10.0
libtpu: 0.0.40
codegen_flags: <defaults>
</compile_context>

<pallas_src>
import functools

import jax
import jax.numpy as jnp
from jax.experimental import pallas as pl
from jax.experimental.pallas import tpu as pltpu

HIDDEN = 256
OUT_PAD = 128  # lane-dense padded width for the final (scalar) output column


def _round_up(x, m):
    return (x + m - 1) // m * m


def critic_kernel(s_ref, a_ref, w1s_ref, w1a_ref, b1_ref,
                  w2_ref, b2_ref, w3_ref, b3_ref, q_ref):
    # Layer 1 (fused concat): (TB, obs) @ (obs, 256) + (TB, act) @ (act, 256) + b1, ReLU
    h1 = jnp.dot(s_ref[...], w1s_ref[...], preferred_element_type=jnp.float32)
    h1 = h1 + jnp.dot(a_ref[...], w1a_ref[...], preferred_element_type=jnp.float32)
    h1 = jnp.maximum(h1 + b1_ref[...], 0.0)
    # Layer 2: (TB, 256) @ (256, 256) + b2, ReLU
    h2 = jnp.dot(h1, w2_ref[...], preferred_element_type=jnp.float32)
    h2 = jnp.maximum(h2 + b2_ref[...], 0.0)
    # Layer 3 (lane-dense, zero-padded): (TB, 256) @ (256, 128) + b3
    q = jnp.dot(h2, w3_ref[...], preferred_element_type=jnp.float32) + b3_ref[...]
    q_ref[...] = q.astype(q_ref.dtype)


@functools.partial(jax.jit, static_argnames=("tb_target",))
def critic_forward(state, action, params, *, tb_target=256):
    """state: (B, obs), action: (B, act). Returns q: (B, 1)."""
    w1, b1, w2, b2, w3, b3 = params
    B, obs = state.shape
    act = action.shape[1]

    # Split the first-layer weight instead of concatenating activations.
    w1s = w1[:obs]   # (obs, 256)
    w1a = w1[obs:]   # (act, 256)

    # Zero-pad the final layer to a lane-dense (multiple-of-128) output width.
    w3p = jnp.zeros((HIDDEN, OUT_PAD), w3.dtype).at[:, :1].set(w3)
    b3p = jnp.zeros((1, OUT_PAD), b3.dtype).at[:, :1].set(b3)

    # Batch tile: 256 rows for large batches (one full MXU-height LHS tile on
    # v6e/v7x; the compiler splits into 2x128 passes on v5e), otherwise the
    # batch rounded up to a sublane multiple of 8.
    TB = tb_target if B >= tb_target else _round_up(B, 8)
    Bp = _round_up(B, TB)
    if Bp != B:
        pad = ((0, Bp - B), (0, 0))
        state = jnp.pad(state, pad)
        action = jnp.pad(action, pad)
    grid = (Bp // TB,)

    resident = lambda a: pl.BlockSpec(a.shape, lambda i: (0, 0))

    q_pad = pl.pallas_call(
        critic_kernel,
        out_shape=jax.ShapeDtypeStruct((Bp, OUT_PAD), jnp.float32),
        grid=grid,
        in_specs=[
            pl.BlockSpec((TB, obs), lambda i: (i, 0)),   # state tile
            pl.BlockSpec((TB, act), lambda i: (i, 0)),   # action tile
            resident(w1s), resident(w1a), resident(b1),
            resident(w2), resident(b2),
            resident(w3p), resident(b3p),
        ],
        out_specs=pl.BlockSpec((TB, OUT_PAD), lambda i: (i, 0)),
        compiler_params=pltpu.CompilerParams(
            dimension_semantics=("parallel",),
        ),
    )(state, action, w1s, w1a, b1, w2, b2, w3p, b3p)

    return q_pad[:B, :1]


def init_critic_params(key, observation_shape, action_shape, init_w=0.003):
    """Deterministic init mirroring nn.Linear defaults + the uniform(-init_w, init_w)
    override on linear3. Weights stored as (in, out)."""
    d_in = observation_shape + action_shape
    k1, k2, k3, k4, k5, k6 = jax.random.split(key, 6)

    def linear_init(kw, kb, fan_in, fan_out):
        bound = 1.0 / jnp.sqrt(jnp.float32(fan_in))
        w = jax.random.uniform(kw, (fan_in, fan_out), jnp.float32, -bound, bound)
        b = jax.random.uniform(kb, (1, fan_out), jnp.float32, -bound, bound)
        return w, b

    w1, b1 = linear_init(k1, k2, d_in, HIDDEN)
    w2, b2 = linear_init(k3, k4, HIDDEN, HIDDEN)
    w3 = jax.random.uniform(k5, (HIDDEN, 1), jnp.float32, -init_w, init_w)
    b3 = jax.random.uniform(k6, (1, 1), jnp.float32, -init_w, init_w)
    return (w1, b1, w2, b2, w3, b3)


def critic_reference(state, action, params):
    w1, b1, w2, b2, w3, b3 = params
    sa = jnp.concatenate([state, action], axis=1)
    h = jnp.maximum(sa @ w1 + b1, 0.0)
    h = jnp.maximum(h @ w2 + b2, 0.0)
    return h @ w3 + b3


if __name__ == "__main__":
    key = jax.random.PRNGKey(0)
    kp, ks, ka, ks2, ka2 = jax.random.split(key, 5)

    OBS, ACT = 12, 4
    params = init_critic_params(kp, OBS, ACT, init_w=0.003)

    # Small batch (single grid step, TB rounded to sublane multiple).
    B = 8
    state = jax.random.normal(ks, (B, OBS), jnp.float32)
    action = jax.random.normal(ka, (B, ACT), jnp.float32)
    q = jax.block_until_ready(critic_forward(state, action, params))
    q_ref = critic_reference(state, action, params)
    assert q.shape == (B, 1), q.shape
    assert jnp.allclose(q, q_ref, atol=1e-5, rtol=1e-5), (q, q_ref)

    # Larger, non-multiple batch to exercise the batch grid + padding path.
    B2 = 300
    state2 = jax.random.normal(ks2, (B2, OBS), jnp.float32)
    action2 = jax.random.normal(ka2, (B2, ACT), jnp.float32)
    q2 = jax.block_until_ready(critic_forward(state2, action2, params))
    q2_ref = critic_reference(state2, action2, params)
    assert q2.shape == (B2, 1), q2.shape
    assert jnp.allclose(q2, q2_ref, atol=1e-5, rtol=1e-5)

    print("KERNEL_OK")
</pallas_src>

<mosaic_0001>
module attributes {stable_mosaic.version = 11 : i64} {
  func.func @critic_kernel(%arg0: i32, %arg1: memref<8x12xf32, #tpu.memory_space<vmem>>, %arg2: memref<8x4xf32, #tpu.memory_space<vmem>>, %arg3: memref<12x256xf32, #tpu.memory_space<vmem>>, %arg4: memref<4x256xf32, #tpu.memory_space<vmem>>, %arg5: memref<1x256xf32, #tpu.memory_space<vmem>>, %arg6: memref<256x256xf32, #tpu.memory_space<vmem>>, %arg7: memref<1x256xf32, #tpu.memory_space<vmem>>, %arg8: memref<256x128xf32, #tpu.memory_space<vmem>>, %arg9: memref<1x128xf32, #tpu.memory_space<vmem>>, %arg10: memref<8x128xf32, #tpu.memory_space<vmem>>) attributes {dimension_semantics = [#tpu.dimension_semantics<parallel>], iteration_bounds = array<i64: 1>, scalar_prefetch = 0 : i64, scratch_operands = 0 : i64, tpu.core_type = #tpu.core_type<tc>, window_params = [{transform_indices = @transform_0, window_bounds = array<i64: 8, 12>}, {transform_indices = @transform_1, window_bounds = array<i64: 8, 4>}, {pipeline_mode = #tpu.pipeline_mode<synchronous>, transform_indices = @transform_2, window_bounds = array<i64: 12, 256>}, {pipeline_mode = #tpu.pipeline_mode<synchronous>, transform_indices = @transform_3, window_bounds = array<i64: 4, 256>}, {pipeline_mode = #tpu.pipeline_mode<synchronous>, transform_indices = @transform_4, window_bounds = array<i64: 1, 256>}, {pipeline_mode = #tpu.pipeline_mode<synchronous>, transform_indices = @transform_5, window_bounds = array<i64: 256, 256>}, {pipeline_mode = #tpu.pipeline_mode<synchronous>, transform_indices = @transform_6, window_bounds = array<i64: 1, 256>}, {pipeline_mode = #tpu.pipeline_mode<synchronous>, transform_indices = @transform_7, window_bounds = array<i64: 256, 128>}, {pipeline_mode = #tpu.pipeline_mode<synchronous>, transform_indices = @transform_8, window_bounds = array<i64: 1, 128>}, {transform_indices = @transform_9, window_bounds = array<i64: 8, 128>}]} {
    %c0 = arith.constant 0 : index
    %c0_0 = arith.constant 0 : index
    %0 = vector.load %arg1[%c0, %c0_0] : memref<8x12xf32, #tpu.memory_space<vmem>>, vector<8x12xf32>
    %c0_1 = arith.constant 0 : index
    %c0_2 = arith.constant 0 : index
    %1 = vector.load %arg3[%c0_1, %c0_2] : memref<12x256xf32, #tpu.memory_space<vmem>>, vector<12x256xf32>
    %cst = arith.constant dense<0.000000e+00> : vector<8x256xf32>
    %2 = tpu.matmul %0, %1, %cst {dimension_numbers = #tpu.dot_dimension_numbers<[1], [0], [0], [1], [0, 0, 1, 1], [], []>} : vector<8x12xf32>, vector<12x256xf32>, vector<8x256xf32> -> vector<8x256xf32>
    %c0_3 = arith.constant 0 : index
    %c0_4 = arith.constant 0 : index
    %3 = vector.load %arg2[%c0_3, %c0_4] : memref<8x4xf32, #tpu.memory_space<vmem>>, vector<8x4xf32>
    %c0_5 = arith.constant 0 : index
    %c0_6 = arith.constant 0 : index
    %4 = vector.load %arg4[%c0_5, %c0_6] : memref<4x256xf32, #tpu.memory_space<vmem>>, vector<4x256xf32>
    %cst_7 = arith.constant dense<0.000000e+00> : vector<8x256xf32>
    %5 = tpu.matmul %3, %4, %cst_7 {dimension_numbers = #tpu.dot_dimension_numbers<[1], [0], [0], [1], [0, 0, 1, 1], [], []>} : vector<8x4xf32>, vector<4x256xf32>, vector<8x256xf32> -> vector<8x256xf32>
    %6 = arith.addf %2, %5 : vector<8x256xf32>
    %c0_8 = arith.constant 0 : index
    %c0_9 = arith.constant 0 : index
    %7 = vector.load %arg5[%c0_8, %c0_9] : memref<1x256xf32, #tpu.memory_space<vmem>>, vector<1x256xf32>
    %8 = vector.broadcast %7 : vector<1x256xf32> to vector<8x256xf32>
    %9 = arith.addf %6, %8 : vector<8x256xf32>
    %cst_10 = arith.constant 0.000000e+00 : f32
    %10 = vector.broadcast %cst_10 : f32 to vector<8x256xf32>
    %11 = arith.maximumf %9, %10 : vector<8x256xf32>
    %c0_11 = arith.constant 0 : index
    %c0_12 = arith.constant 0 : index
    %12 = vector.load %arg6[%c0_11, %c0_12] : memref<256x256xf32, #tpu.memory_space<vmem>>, vector<256x256xf32>
    %cst_13 = arith.constant dense<0.000000e+00> : vector<8x256xf32>
    %13 = tpu.matmul %11, %12, %cst_13 {dimension_numbers = #tpu.dot_dimension_numbers<[1], [0], [0], [1], [0, 0, 1, 1], [], []>} : vector<8x256xf32>, vector<256x256xf32>, vector<8x256xf32> -> vector<8x256xf32>
    %c0_14 = arith.constant 0 : index
    %c0_15 = arith.constant 0 : index
    %14 = vector.load %arg7[%c0_14, %c0_15] : memref<1x256xf32, #tpu.memory_space<vmem>>, vector<1x256xf32>
    %15 = vector.broadcast %14 : vector<1x256xf32> to vector<8x256xf32>
    %16 = arith.addf %13, %15 : vector<8x256xf32>
    %cst_16 = arith.constant 0.000000e+00 : f32
    %17 = vector.broadcast %cst_16 : f32 to vector<8x256xf32>
    %18 = arith.maximumf %16, %17 : vector<8x256xf32>
    %c0_17 = arith.constant 0 : index
    %c0_18 = arith.constant 0 : index
    %19 = vector.load %arg8[%c0_17, %c0_18] : memref<256x128xf32, #tpu.memory_space<vmem>>, vector<256x128xf32>
    %cst_19 = arith.constant dense<0.000000e+00> : vector<8x128xf32>
    %20 = tpu.matmul %18, %19, %cst_19 {dimension_numbers = #tpu.dot_dimension_numbers<[1], [0], [0], [1], [0, 0, 1, 1], [], []>} : vector<8x256xf32>, vector<256x128xf32>, vector<8x128xf32> -> vector<8x128xf32>
    %c0_20 = arith.constant 0 : index
    %c0_21 = arith.constant 0 : index
    %21 = vector.load %arg9[%c0_20, %c0_21] : memref<1x128xf32, #tpu.memory_space<vmem>>, vector<1x128xf32>
    %22 = vector.broadcast %21 : vector<1x128xf32> to vector<8x128xf32>
    %23 = arith.addf %20, %22 : vector<8x128xf32>
    %c0_22 = arith.constant 0 : index
    %c0_23 = arith.constant 0 : index
    %24 = vector.load %arg10[%c0_22, %c0_23] : memref<8x128xf32, #tpu.memory_space<vmem>>, vector<8x128xf32>
    tpu.vector_store %arg10[%c0_22, %c0_23], %23 {strides = array<i32>} : memref<8x128xf32, #tpu.memory_space<vmem>>, vector<8x128xf32>,
    return
  }
  func.func @transform_0(%arg0: i32) -> (i32, i32) {
    %c0_i32 = arith.constant 0 : i32
    %c0_i32_0 = arith.constant 0 : i32
    return %arg0, %c0_i32 : i32, i32
  }
  func.func @transform_1(%arg0: i32) -> (i32, i32) {
    %c0_i32 = arith.constant 0 : i32
    %c0_i32_0 = arith.constant 0 : i32
    return %arg0, %c0_i32 : i32, i32
  }
  func.func @transform_2(%arg0: i32) -> (i32, i32) {
    %c0_i32 = arith.constant 0 : i32
    %c0_i32_0 = arith.constant 0 : i32
    %c0_i32_1 = arith.constant 0 : i32
    return %c0_i32, %c0_i32_0 : i32, i32
  }
  func.func @transform_3(%arg0: i32) -> (i32, i32) {
    %c0_i32 = arith.constant 0 : i32
    %c0_i32_0 = arith.constant 0 : i32
    %c0_i32_1 = arith.constant 0 : i32
    return %c0_i32, %c0_i32_0 : i32, i32
  }
  func.func @transform_4(%arg0: i32) -> (i32, i32) {
    %c0_i32 = arith.constant 0 : i32
    %c0_i32_0 = arith.constant 0 : i32
    %c0_i32_1 = arith.constant 0 : i32
    return %c0_i32, %c0_i32_0 : i32, i32
  }
  func.func @transform_5(%arg0: i32) -> (i32, i32) {
    %c0_i32 = arith.constant 0 : i32
    %c0_i32_0 = arith.constant 0 : i32
    %c0_i32_1 = arith.constant 0 : i32
    return %c0_i32, %c0_i32_0 : i32, i32
  }
  func.func @transform_6(%arg0: i32) -> (i32, i32) {
    %c0_i32 = arith.constant 0 : i32
    %c0_i32_0 = arith.constant 0 : i32
    %c0_i32_1 = arith.constant 0 : i32
    return %c0_i32, %c0_i32_0 : i32, i32
  }
  func.func @transform_7(%arg0: i32) -> (i32, i32) {
    %c0_i32 = arith.constant 0 : i32
    %c0_i32_0 = arith.constant 0 : i32
    %c0_i32_1 = arith.constant 0 : i32
    return %c0_i32, %c0_i32_0 : i32, i32
  }
  func.func @transform_8(%arg0: i32) -> (i32, i32) {
    %c0_i32 = arith.constant 0 : i32
    %c0_i32_0 = arith.constant 0 : i32
    %c0_i32_1 = arith.constant 0 : i32
    return %c0_i32, %c0_i32_0 : i32, i32
  }
  func.func @transform_9(%arg0: i32) -> (i32, i32) {
    %c0_i32 = arith.constant 0 : i32
    %c0_i32_0 = arith.constant 0 : i32
    return %arg0, %c0_i32 : i32, i32
  }
}

</mosaic_0001>

<bundles_post_ra>
// kernel: critic_forward.1
= control target key start
LH: loop header
LB: loop body
LE: loop exit
PB: predicated region body
PF: predicated region fallthrough
CT: control target
= control target key end

     0   :  { %vm45_vm0 = vcmask 1043456   ;;  %v525_v1 = vmov 0.0   ;;  %vm41_vm1 = vcmask 31744   ;;  %vm121_vm2 = vcmask 97280   ;;  %s901_s3 = inlined_call_operand.vmem [shape: f32[4,256], index: 3, kind: input, shape index: {}]   ;;  %s902_s1 = inlined_call_operand.vmem [shape: f32[8,4], index: 1, kind: input, shape index: {}]   ;;  %s903_s2 = inlined_call_operand.vmem [shape: f32[12,256], index: 2, kind: input, shape index: {}]   ;;  %s904_s5 = inlined_call_operand.vmem [shape: f32[256,256], index: 5, kind: input, shape index: {}]   ;;  %s905_s0 = inlined_call_operand.vmem [shape: f32[8,12], index: 0, kind: input, shape index: {}]   ;;  %s906_s7 = inlined_call_operand.vmem [shape: f32[256,128], index: 7, kind: input, shape index: {}]   ;;  %s907_s4 = inlined_call_operand.vmem [shape: f32[1,256], index: 4, kind: input, shape index: {}]   ;;  %s908_s6 = inlined_call_operand.vmem [shape: f32[1,256], index: 6, kind: input, shape index: {}]   ;;  %s909_s8 = inlined_call_operand.vmem [shape: f32[1,128], index: 8, kind: input, shape index: {}]   ;;  %s910_s9 = inlined_call_operand.vmem [shape: f32[8,128], index: 9, kind: output, shape index: {}]  }
   0x1   :  { %v38_v0 = vld [vmem:[%s901_s3] sm:$0xff]  ;;  %114 = vmatprep.mubr.f32.mxu1 %v525_v1  ;;  %v36_v4 = vld [vmem:[%s903_s2 + $0x18] sm:$0xf]  ;;  %v248_v6 = vld [vmem:[%s904_s5 + $0xf0] sm:$0xff] }
   0x2   :  { %v40_v2 = vcombine.high %v38_v0, %v38_v0  ;;  %v37_v3 = vld [vmem:[%s902_s1] sm:$0xff]  ;;  %v249_v5 = vld [vmem:[%s904_s5 + $0xf8] sm:$0xff]  ;;  %v35_v7 = vld [vmem:[%s903_s2 + $0x10] sm:$0xf] }
   0x3   :  { %294 = vmatprep.subr.mxu0 %v249_v5  ;;  %v34_v8 = vld [vmem:[%s903_s2 + $0x8] sm:$0xff]  ;;  %v33_v10 = vld [vmem:[%s903_s2] sm:$0xff]  ;;  %v245_v13 = vld [vmem:[%s904_s5 + $0xd8] sm:$0xff] }
   0x4   :  { %481 = vmatprep.subr.msk.mxu1 %vm45_vm0, %v40_v2  ;;  %295 = vmatpush1.msra.mxu0 %v248_v6  ;;  %v247_v9 = vld [vmem:[%s904_s5 + $0xe8] sm:$0xff]  ;;  %v246_v11 = vld [vmem:[%s904_s5 + $0xe0] sm:$0xff]  ;;  %v244_v14 = vld [vmem:[%s904_s5 + $0xd0] sm:$0xff] }
   0x5   :  { %482 = vmatpush1.msk.msra.mxu1 %vm45_vm0, %v38_v0  ;;  %v32_v12 = vld [vmem:[%s905_s0] sm:$0xff]  ;;  %296 = vmatprep.subr.mxu0 %v247_v9  ;;  %v243_v15 = vld [vmem:[%s904_s5 + $0xc8] sm:$0xff]  ;;  %v241_v17 = vld [vmem:[%s904_s5 + $0xb8] sm:$0xff] }
   0x6   :  { %483 = vmatmul.mubr.msk.f32.vlgmr.msra.gmra.mxu1 %vm41_vm1, %v37_v3  ;;  %484 = vmatprep.subr.msk.mxu1 %vm45_vm0, %v36_v4  ;;  %v242_v16 = vld [vmem:[%s904_s5 + $0xc0] sm:$0xff]  ;;  %v240_v18 = vld [vmem:[%s904_s5 + $0xb0] sm:$0xff]  ;;  %v239_v19 = vld [vmem:[%s904_s5 + $0xa8] sm:$0xff] }
   0x7   :  { %485 = vmatpush1.msk.msra.mxu1 %vm45_vm0, %v35_v7  ;;  %195 = vmatprep.mubr.f32.mxu1 %v525_v1  ;;  %v238_v20 = vld [vmem:[%s904_s5 + $0xa0] sm:$0xff]  ;;  %v237_v21 = vld [vmem:[%s904_s5 + $0x98] sm:$0xff]  ;;  %v236_v22 = vld [vmem:[%s904_s5 + $0x90] sm:$0xff] }
   0x8   :  { %161 = vmatprep.subr.mxu1 %v34_v8  ;;  %297 = vmatpush1.msra.mxu0 %v246_v11  ;;  %v235_v23 = vld [vmem:[%s904_s5 + $0x88] sm:$0xff]  ;;  %v234_v24 = vld [vmem:[%s904_s5 + $0x80] sm:$0xff]  ;;  %v233_v25 = vld [vmem:[%s904_s5 + $0x78] sm:$0xff] }
   0x9   :  { %162 = vmatpush1.msra.mxu1 %v33_v10  ;;  %298 = vmatprep.subr.mxu0 %v245_v13  ;;  %v232_v26 = vld [vmem:[%s904_s5 + $0x70] sm:$0xff]  ;;  %v231_v27 = vld [vmem:[%s904_s5 + $0x68] sm:$0xff]  ;;  %v230_v28 = vld [vmem:[%s904_s5 + $0x60] sm:$0xff] }
   0xa   :  { %486 = vmatmul.mubr.msk.f32.vlgmr.msra.gmra.mxu1 %vm121_vm2, %v32_v12  ;;  %299 = vmatpush1.msra.mxu0 %v244_v14  ;;  %v229_v29 = vld [vmem:[%s904_s5 + $0x58] sm:$0xff]  ;;  %v228_v30 = vld [vmem:[%s904_s5 + $0x50] sm:$0xff]  ;;  %v227_v31 = vld [vmem:[%s904_s5 + $0x48] sm:$0xff] }
   0xb   :  { %300 = vmatprep.subr.mxu0 %v243_v15  ;;  %v226_v32 = vld [vmem:[%s904_s5 + $0x40] sm:$0xff]  ;;  %v225_v33 = vld [vmem:[%s904_s5 + $0x38] sm:$0xff]  ;;  %v224_v34 = vld [vmem:[%s904_s5 + $0x30] sm:$0xff] }
   0xc   :  { %301 = vmatpush1.msra.mxu0 %v242_v16  ;;  %v223_v35 = vld [vmem:[%s904_s5 + $0x28] sm:$0xff]  ;;  %v222_v36 = vld [vmem:[%s904_s5 + $0x20] sm:$0xff]  ;;  %v221_v37 = vld [vmem:[%s904_s5 + $0x18] sm:$0xff] }
   0xd   :  { %302 = vmatprep.subr.mxu0 %v241_v17  ;;  %v220_v38 = vld [vmem:[%s904_s5 + $0x10] sm:$0xff]  ;;  %v219_v39 = vld [vmem:[%s904_s5 + $0x8] sm:$0xff]  ;;  %v218_v40 = vld [vmem:[%s904_s5] sm:$0xff] }
   0xe   :  { %303 = vmatpush1.msra.mxu0 %v240_v18  ;;  %v281_v41 = vld [vmem:[%s904_s5 + $0x1f8] sm:$0xff]  ;;  %v280_v42 = vld [vmem:[%s904_s5 + $0x1f0] sm:$0xff]  ;;  %v279_v43 = vld [vmem:[%s904_s5 + $0x1e8] sm:$0xff] }
   0xf   :  { %304 = vmatprep.subr.mxu0 %v239_v19  ;;  %v278_v44 = vld [vmem:[%s904_s5 + $0x1e0] sm:$0xff]  ;;  %v277_v45 = vld [vmem:[%s904_s5 + $0x1d8] sm:$0xff]  ;;  %v276_v46 = vld [vmem:[%s904_s5 + $0x1d0] sm:$0xff] }
  0x10   :  { %305 = vmatpush1.msra.mxu0 %v238_v20  ;;  %v275_v47 = vld [vmem:[%s904_s5 + $0x1c8] sm:$0xff]  ;;  %v274_v48 = vld [vmem:[%s904_s5 + $0x1c0] sm:$0xff]  ;;  %v273_v49 = vld [vmem:[%s904_s5 + $0x1b8] sm:$0xff] }
  0x11   :  { %306 = vmatprep.subr.mxu0 %v237_v21  ;;  %v272_v50 = vld [vmem:[%s904_s5 + $0x1b0] sm:$0xff]  ;;  %v271_v51 = vld [vmem:[%s904_s5 + $0x1a8] sm:$0xff]  ;;  %v270_v52 = vld [vmem:[%s904_s5 + $0x1a0] sm:$0xff] }
  0x12   :  { %307 = vmatpush1.msra.mxu0 %v236_v22  ;;  %v269_v53 = vld [vmem:[%s904_s5 + $0x198] sm:$0xff]  ;;  %v268_v54 = vld [vmem:[%s904_s5 + $0x190] sm:$0xff]  ;;  %v267_v55 = vld [vmem:[%s904_s5 + $0x188] sm:$0xff] }
  0x13   :  { %308 = vmatprep.subr.mxu0 %v235_v23  ;;  %v266_v56 = vld [vmem:[%s904_s5 + $0x180] sm:$0xff]  ;;  %v265_v57 = vld [vmem:[%s904_s5 + $0x178] sm:$0xff]  ;;  %v264_v58 = vld [vmem:[%s904_s5 + $0x170] sm:$0xff] }
  0x14   :  { %309 = vmatpush1.msra.mxu0 %v234_v24  ;;  %v263_v59 = vld [vmem:[%s904_s5 + $0x168] sm:$0xff]  ;;  %v262_v60 = vld [vmem:[%s904_s5 + $0x160] sm:$0xff]  ;;  %v261_v61 = vld [vmem:[%s904_s5 + $0x158] sm:$0xff] }
  0x15   :  { %310 = vmatprep.subr.mxu0 %v233_v25  ;;  %v260_v62 = vld [vmem:[%s904_s5 + $0x150] sm:$0xff]  ;;  %v259_v63 = vld [vmem:[%s904_s5 + $0x148] sm:$0xff]  ;;  %v258_v0 = vld [vmem:[%s904_s5 + $0x140] sm:$0xff] }
  0x16   :  { %311 = vmatpush1.msra.mxu0 %v232_v26  ;;  %v257_v1 = vld [vmem:[%s904_s5 + $0x138] sm:$0xff]  ;;  %v256_v2 = vld [vmem:[%s904_s5 + $0x130] sm:$0xff]  ;;  %v255_v3 = vld [vmem:[%s904_s5 + $0x128] sm:$0xff] }
  0x17   :  { %312 = vmatprep.subr.mxu0 %v231_v27  ;;  %v254_v4 = vld [vmem:[%s904_s5 + $0x120] sm:$0xff]  ;;  %v253_v5 = vld [vmem:[%s904_s5 + $0x118] sm:$0xff]  ;;  %v252_v6 = vld [vmem:[%s904_s5 + $0x110] sm:$0xff] }
  0x18   :  { %313 = vmatpush1.msra.mxu0 %v230_v28  ;;  %v251_v7 = vld [vmem:[%s904_s5 + $0x108] sm:$0xff]  ;;  %v250_v8 = vld [vmem:[%s904_s5 + $0x100] sm:$0xff]  ;;  %v398_v9 = vld [vmem:[%s906_s7 + $0xf8] sm:$0xff] }
  0x19   :  { %314 = vmatprep.subr.mxu0 %v229_v29  ;;  %v382_v10 = vld [vmem:[%s906_s7 + $0x78] sm:$0xff]  ;;  %v397_v11 = vld [vmem:[%s906_s7 + $0xf0] sm:$0xff]  ;;  %488 = vmatprep.subr.mxu1 %v398_v9  ;;  %v396_v13 = vld [vmem:[%s906_s7 + $0xe8] sm:$0xff] }
  0x1a   :  { %315 = vmatpush1.msra.mxu0 %v228_v30  ;;  %v381_v12 = vld [vmem:[%s906_s7 + $0x70] sm:$0xff]  ;;  %489 = vmatpush3.msra.mxu1 %v382_v10  ;;  %v380_v14 = vld [vmem:[%s906_s7 + $0x68] sm:$0xff]  ;;  %v395_v15 = vld [vmem:[%s906_s7 + $0xe0] sm:$0xff] }
  0x1b   :  { %316 = vmatprep.subr.mxu0 %v227_v31  ;;  %490 = vmatprep.subr.mxu1 %v397_v11  ;;  %v379_v16 = vld [vmem:[%s906_s7 + $0x60] sm:$0xff]  ;;  %v394_v17 = vld [vmem:[%s906_s7 + $0xd8] sm:$0xff]  ;;  %v393_v19 = vld [vmem:[%s906_s7 + $0xd0] sm:$0xff] }
  0x1c   :  { %317 = vmatpush1.msra.mxu0 %v226_v32  ;;  %491 = vmatpush3.msra.mxu1 %v381_v12  ;;  %v378_v18 = vld [vmem:[%s906_s7 + $0x58] sm:$0xff]  ;;  %v377_v20 = vld [vmem:[%s906_s7 + $0x50] sm:$0xff]  ;;  %v392_v21 = vld [vmem:[%s906_s7 + $0xc8] sm:$0xff] }
  0x1d   :  { %318 = vmatprep.subr.mxu0 %v225_v33  ;;  %492 = vmatprep.subr.mxu1 %v396_v13  ;;  %v376_v22 = vld [vmem:[%s906_s7 + $0x48] sm:$0xff]  ;;  %v391_v23 = vld [vmem:[%s906_s7 + $0xc0] sm:$0xff]  ;;  %v390_v25 = vld [vmem:[%s906_s7 + $0xb8] sm:$0xff]  ;;  %v204_v33 = vlaneseq }
  0x1e   :  { %319 = vmatpush1.msra.mxu0 %v224_v34  ;;  %493 = vmatpush3.msra.mxu1 %v380_v14  ;;  %v375_v24 = vld [vmem:[%s906_s7 + $0x40] sm:$0xff]  ;;  %v374_v26 = vld [vmem:[%s906_s7 + $0x38] sm:$0xff]  ;;  %v389_v27 = vld [vmem:[%s906_s7 + $0xb0] sm:$0xff] }
  0x1f   :  { %320 = vmatprep.subr.mxu0 %v223_v35  ;;  %494 = vmatprep.subr.mxu1 %v395_v15  ;;  %v373_v28 = vld [vmem:[%s906_s7 + $0x30] sm:$0xff]  ;;  %v388_v29 = vld [vmem:[%s906_s7 + $0xa8] sm:$0xff]  ;;  %v387_v31 = vld [vmem:[%s906_s7 + $0xa0] sm:$0xff]  ;;  %v205_v34 = vshrl.u32 %v204_v33, 7 }
  0x20   :  { %321 = vmatpush1.msra.mxu0 %v222_v36  ;;  %495 = vmatpush3.msra.mxu1 %v379_v16  ;;  %v372_v30 = vld [vmem:[%s906_s7 + $0x28] sm:$0xff]  ;;  %v371_v32 = vld [vmem:[%s906_s7 + $0x20] sm:$0xff] }
  0x21   :  { %322 = vmatprep.subr.mxu0 %v221_v37  ;;  %496 = vmatprep.subr.mxu1 %v394_v17  ;;  %v206_v36 = vsub.s32 0, %v205_v34  ;;  %v202_v37 = vld [vmem:[%s907_s4] sm:$0x3] }
  0x22   :  { %323 = vmatpush1.msra.mxu0 %v220_v38  ;;  %497 = vmatpush3.msra.mxu1 %v378_v18  ;;  %v210_v38 = vsub.s32 1, %v205_v34 }
  0x23   :  { %324 = vmatprep.subr.mxu0 %v219_v39  ;;  %498 = vmatprep.subr.mxu1 %v393_v19 }
  0x24   :  { %325 = vmatpush1.msra.mxu0 %v218_v40  ;;  %499 = vmatpush3.msra.mxu1 %v377_v20 }
  0x25   :  { %326 = vmatprep.subr.mxu0 %v281_v41  ;;  %500 = vmatprep.subr.mxu1 %v392_v21  ;;  %v207_v41 = vrot.slane %v202_v37, %v206_v36 }
  0x26   :  { %327 = vmatpush2.msra.mxu0 %v280_v42  ;;  %501 = vmatpush3.msra.mxu1 %v376_v22 }
  0x27   :  { %328 = vmatprep.subr.mxu0 %v279_v43  ;;  %502 = vmatprep.subr.mxu1 %v391_v23  ;;  %v211_v43 = vrot.slane %v202_v37, %v210_v38 }
  0x28   :  { %329 = vmatpush2.msra.mxu0 %v278_v44  ;;  %503 = vmatpush3.msra.mxu1 %v375_v24 }
  0x29   :  { %330 = vmatprep.subr.mxu0 %v277_v45  ;;  %504 = vmatprep.subr.mxu1 %v390_v25 }
  0x2a   :  { %331 = vmatpush2.msra.mxu0 %v276_v46  ;;  %505 = vmatpush3.msra.mxu1 %v374_v26 }
  0x2b   :  { %332 = vmatprep.subr.mxu0 %v275_v47  ;;  %506 = vmatprep.subr.mxu1 %v389_v27 }
  0x2c   :  { %333 = vmatpush2.msra.mxu0 %v274_v48  ;;  %507 = vmatpush3.msra.mxu1 %v373_v28 }
  0x2d   :  { %334 = vmatprep.subr.mxu0 %v273_v49  ;;  %508 = vmatprep.subr.mxu1 %v388_v29 }
  0x2e   :  { %335 = vmatpush2.msra.mxu0 %v272_v50  ;;  %509 = vmatpush3.msra.mxu1 %v372_v30  ;;  %v386_v50 = vld [vmem:[%s906_s7 + $0x98] sm:$0xff] }
  0x2f   :  { %336 = vmatprep.subr.mxu0 %v271_v51  ;;  %510 = vmatprep.subr.mxu1 %v387_v31  ;;  %v370_v51 = vld [vmem:[%s906_s7 + $0x18] sm:$0xff] }
  0x30   :  { %337 = vmatpush2.msra.mxu0 %v270_v52  ;;  %511 = vmatpush3.msra.mxu1 %v371_v32  ;;  %v385_v52 = vld [vmem:[%s906_s7 + $0x90] sm:$0xff] }
  0x31   :  { %338 = vmatprep.subr.mxu0 %v269_v53  ;;  %512 = vmatprep.subr.mxu1 %v386_v50  ;;  %v369_v53 = vld [vmem:[%s906_s7 + $0x10] sm:$0xff] }
  0x32   :  { %339 = vmatpush2.msra.mxu0 %v268_v54  ;;  %513 = vmatpush3.msra.mxu1 %v370_v51  ;;  %v384_v54 = vld [vmem:[%s906_s7 + $0x88] sm:$0xff] }
  0x33   :  { %340 = vmatprep.subr.mxu0 %v267_v55  ;;  %514 = vmatprep.subr.mxu1 %v385_v52  ;;  %v368_v55 = vld [vmem:[%s906_s7 + $0x8] sm:$0xff] }
  0x34   :  { %341 = vmatpush2.msra.mxu0 %v266_v56  ;;  %515 = vmatpush3.msra.mxu1 %v369_v53  ;;  %v383_v56 = vld [vmem:[%s906_s7 + $0x80] sm:$0xff] }
  0x35   :  { %342 = vmatprep.subr.mxu0 %v265_v57  ;;  %516 = vmatprep.subr.mxu1 %v384_v54  ;;  %v367_v57 = vld [vmem:[%s906_s7] sm:$0xff] }
  0x36   :  { %343 = vmatpush2.msra.mxu0 %v264_v58  ;;  %517 = vmatpush3.msra.mxu1 %v368_v55  ;;  %v282_v58 = vld [vmem:[%s908_s6] sm:$0x3] }
  0x37   :  { %344 = vmatprep.subr.mxu0 %v263_v59  ;;  %518 = vmatprep.subr.mxu1 %v383_v56  ;;  %v287_v59 = vrot.slane %v282_v58, %v206_v36 }
  0x38   :  { %345 = vmatpush2.msra.mxu0 %v262_v60  ;;  %519 = vmatpush3.msra.mxu1 %v367_v57  ;;  %v291_v60 = vrot.slane %v282_v58, %v210_v38 }
  0x39   :  { %346 = vmatprep.subr.mxu0 %v261_v61 }
  0x3a   :  { %347 = vmatpush2.msra.mxu0 %v260_v62 }
  0x3b   :  { %348 = vmatprep.subr.mxu0 %v259_v63 }
  0x3c   :  { %349 = vmatpush2.msra.mxu0 %v258_v0 }
  0x3d   :  { %350 = vmatprep.subr.mxu0 %v257_v1 }
  0x3e   :  { %351 = vmatpush2.msra.mxu0 %v256_v2 }
  0x3f   :  { %352 = vmatprep.subr.mxu0 %v255_v3 }
  0x40   :  { %353 = vmatpush2.msra.mxu0 %v254_v4  ;;  %v487_v4 = vld [vmem:[%s909_s8] ss:$0 sm:$0xff] }
  0x41   :  { %354 = vmatprep.subr.mxu0 %v253_v5 }
  0x42   :  { %355 = vmatpush2.msra.mxu0 %v252_v6 }
  0x43   :  { %356 = vmatprep.subr.mxu0 %v251_v7 }
  0x44   :  { %357 = vmatpush2.msra.mxu0 %v250_v8 }
  0xc6   :  { %v116_v35 = vpop.f32.mrf.mxu1 }
  0xc8   :  { %v118_v39 = vpop.f32.mrf.mxu1 }
  0xca   :  { %v197_v40 = vpop.f32.mrf.mxu1 }
  0xcb   :  { %v198_v42 = vadd.f32 %v197_v40, %v116_v35 }
  0xcc   :  { %v199_v44 = vpop.f32.mrf.mxu1 }
  0xcd   :  { %v200_v45 = vadd.f32 %v199_v44, %v118_v39  ;;  %v214_v46 = vadd.f32 %v207_v41, %v198_v42 }
  0xcf   :  { %v215_v47 = vadd.f32 %v211_v43, %v200_v45  ;;  %v216_v49 = vmax.f32 %v214_v46, 0.0 }
  0xd1   :  { %v217_v48 = vmax.f32 %v215_v47, 0.0 }
  0xd3   :  { %358 = vmatprep.mubr.f32.mxu0 %v217_v48 }
  0xd4   :  { %359 = vmatmul.mubr.f32.vlgmr.msra.gmra.mxu0 %v216_v49 }
 0x194   :  { %v360_v61 = vpop.f32.mrf.mxu0 }
 0x195   :  { %v361_v62 = vadd.f32 %v360_v61, %v287_v59 }
 0x196   :  { %v362_v63 = vpop.f32.mrf.mxu0 }
 0x197   :  { %v363_v0 = vadd.f32 %v362_v63, %v291_v60  ;;  %v365_v2 = vmax.f32 %v361_v62, 0.0 }
 0x199   :  { %v366_v1 = vmax.f32 %v363_v0, 0.0 }
 0x19b   :  { %470 = vmatprep.mubr.f32.mxu1 %v366_v1 }
 0x19c   :  { %471 = vmatmul.mubr.f32.vlgmr.msra.gmra.mxu1 %v365_v2 }
 0x25c   :  { %v520_v3 = vpop.f32.mrf.mxu1 }
 0x25e   :  { %v521_v5 = vpop.f32.mrf.mxu1 }
 0x25f   :  { %v522_v6 = vadd.f32 %v521_v5, %v520_v3 }
 0x261   :  { %v473_v7 = vadd.f32 %v522_v6, %v487_v4 }
 0x263   :  { %476 = vst [vmem:[%s910_s9] sm:$0xff] %v473_v7 }

</bundles_post_ra>
